<compile_context>
chip_gen: v5e
topology: v5e:2x2
jax: 0.10.0
libtpu: 0.0.40
codegen_flags: <defaults>
</compile_context>

<pallas_src>
import functools
import math

import jax
import jax.numpy as jnp
from jax.experimental import pallas as pl
from jax.experimental.pallas import tpu as pltpu

NEG_INF = -1e30  # finite "-inf": avoids inf-inf NaNs in the online softmax


# ------------------------------ small helpers -------------------------------

def _round_up(x, m):
    return ((x + m - 1) // m) * m


@functools.lru_cache(maxsize=None)
def _vmem_limit_bytes():
    """~75% of physical VMEM (≈48 MiB on v7x, 96 MiB on v5e/v6e), capped."""
    try:
        cap = getattr(pltpu.get_tpu_info(), "vmem_capacity_bytes", 0)
        if cap:
            return int(min(cap * 3 // 4, 96 * 1024 * 1024))
    except Exception:
        pass
    return 48 * 1024 * 1024


def _pick_tile(dim, target, align):
    """Largest multiple of `align` that divides `dim` and is <= target.
    Falls back to the full dim (always legal w.r.t. the (8,128) rule)."""
    if dim <= target:
        return dim
    t = (min(target, dim) // align) * align
    while t >= align:
        if dim % t == 0:
            return t
        t -= align
    return dim


def _head_grouping(D, n_head):
    """How heads are folded into lane-aligned groups inside the fused QKV."""
    Dh = D // n_head
    if D % 128 == 0:
        g = next(g for g in range(1, n_head + 1)
                 if n_head % g == 0 and (g * Dh) % 128 == 0)
        return dict(Dh=Dh, Dsec=D, blk=g * Dh, gp=g, ngroups=n_head // g)
    # Tiny / odd D: pad each Q/K/V section to a lane-aligned width that is a
    # multiple of Dh; extra lanes carry zeros (pseudo-heads that output zero).
    dsec = _round_up(D, math.lcm(Dh, 128))
    return dict(Dh=Dh, Dsec=dsec, blk=dsec, gp=dsec // Dh, ngroups=1)


def _attn_tiles(T):
    """(tq, tkv, T_pad); every kv tile is guaranteed >= 1 valid key."""
    if T <= 512:
        t = _round_up(T, 8)
        return t, t, t
    return 128, 512, _round_up(T, 512)


# --------------------------- tiled linear (x @ Wt + b) ----------------------

def _linear_kernel(x_ref, wt_ref, b_ref, o_ref, acc_ref):
    # x: (tm, tk) bf16, wt: (tk, tn) bf16 (pre-transposed), b: (1, tn) f32
    @pl.when(pl.program_id(2) == 0)
    def _():
        acc_ref[...] = jnp.zeros_like(acc_ref)

    acc_ref[...] += jnp.dot(x_ref[...], wt_ref[...],
                            preferred_element_type=jnp.float32)

    @pl.when(pl.program_id(2) == pl.num_programs(2) - 1)
    def _():
        o_ref[...] = (acc_ref[...] + b_ref[...]).astype(o_ref.dtype)


def pallas_linear(x2d, wt, b2d, out_dtype, *, tm=256, tn=256, tk=512):
    """x2d: (M, K) bf16; wt: (K, N) pre-transposed bf16 weight; b2d: (1, N) f32."""
    M, K = x2d.shape
    K2, N = wt.shape
    assert K2 == K and b2d.shape == (1, N)
    tm = _pick_tile(M, tm, 8)
    tn = _pick_tile(N, tn, 128)   # target 256: prefers 256-aligned tiles when they fit
    tk = _pick_tile(K, tk, 128)
    grid = (M // tm, N // tn, K // tk)
    return pl.pallas_call(
        _linear_kernel,
        out_shape=jax.ShapeDtypeStruct((M, N), out_dtype),
        grid=grid,
        in_specs=[
            pl.BlockSpec((tm, tk), lambda i, j, k: (i, k)),
            pl.BlockSpec((tk, tn), lambda i, j, k: (k, j)),
            pl.BlockSpec((1, tn), lambda i, j, k: (0, j)),
        ],
        out_specs=pl.BlockSpec((tm, tn), lambda i, j, k: (i, j)),
        scratch_shapes=[pltpu.VMEM((tm, tn), jnp.float32)],
        compiler_params=pltpu.CompilerParams(
            dimension_semantics=("parallel", "parallel", "arbitrary"),
            vmem_limit_bytes=_vmem_limit_bytes(),
        ),
    )(x2d, wt, b2d)


# ------------------------- flash attention kernel ---------------------------

def _flash_attn_kernel(q_ref, k_ref, v_ref, o_ref, m_sc, l_sc, acc_sc,
                       *, gp, dh, t_real, masked):
    ki = pl.program_id(3)

    @pl.when(ki == 0)
    def _():
        m_sc[...] = jnp.full_like(m_sc, NEG_INF)
        l_sc[...] = jnp.zeros_like(l_sc)
        acc_sc[...] = jnp.zeros_like(acc_sc)

    tq = q_ref.shape[1]
    tkv = k_ref.shape[1]
    # Single in-kernel relayout to a head-batched layout (no per-head lane slices).
    q = q_ref[0].reshape(tq, gp, dh).transpose(1, 0, 2)    # (gp, tq, dh)  bf16
    k = k_ref[0].reshape(tkv, gp, dh).transpose(1, 0, 2)   # (gp, tkv, dh) bf16
    v = v_ref[0].reshape(tkv, gp, dh).transpose(1, 0, 2)   # (gp, tkv, dh) bf16

    # 1/sqrt(dh) is folded into the Q projection weights -> no scale here.
    s = jnp.einsum("gqd,gkd->gqk", q, k,
                   preferred_element_type=jnp.float32)     # (gp, tq, tkv) f32
    if masked:
        kv_pos = ki * tkv + jax.lax.broadcasted_iota(jnp.int32, (1, 1, tkv), 2)
        s = jnp.where(kv_pos < t_real, s, NEG_INF)

    m_prev = m_sc[...]
    m_new = jnp.maximum(m_prev, jnp.max(s, axis=-1, keepdims=True))
    alpha = jnp.exp(m_prev - m_new)
    p = jnp.exp(s - m_new)
    l_sc[...] = alpha * l_sc[...] + jnp.sum(p, axis=-1, keepdims=True)
    acc_sc[...] = alpha * acc_sc[...] + jnp.einsum(
        "gqk,gkd->gqd", p.astype(v.dtype), v,
        preferred_element_type=jnp.float32)
    m_sc[...] = m_new

    @pl.when(ki == pl.num_programs(3) - 1)
    def _():
        # Exact reciprocal (not approx): keeps softmax numerics close to reference.
        out = acc_sc[...] * pl.reciprocal(l_sc[...], approx=False)
        o_ref[0] = out.transpose(1, 0, 2).reshape(tq, gp * dh).astype(o_ref.dtype)


def pallas_flash_attention(qkv, B, T_pad, t_real, meta, tq, tkv):
    """qkv: (B*T_pad, 3*Dsec) fused projection output -> (B, T_pad, Dsec)."""
    Dsec, blk, gp, ngroups, Dh = (meta["Dsec"], meta["blk"], meta["gp"],
                                  meta["ngroups"], meta["Dh"])
    qkv3 = qkv.reshape(B, T_pad, 3 * Dsec)                 # free reshape
    nq, nkv = T_pad // tq, T_pad // tkv
    kernel = functools.partial(_flash_attn_kernel, gp=gp, dh=Dh,
                               t_real=t_real, masked=(T_pad != t_real))
    return pl.pallas_call(
        kernel,
        out_shape=jax.ShapeDtypeStruct((B, T_pad, Dsec), qkv.dtype),
        grid=(B, ngroups, nq, nkv),
        in_specs=[
            # zero-copy head-group selection straight out of the fused QKV
            pl.BlockSpec((1, tq, blk), lambda b, g, qi, ki: (b, qi, g)),
            pl.BlockSpec((1, tkv, blk), lambda b, g, qi, ki: (b, ki, ngroups + g)),
            pl.BlockSpec((1, tkv, blk), lambda b, g, qi, ki: (b, ki, 2 * ngroups + g)),
        ],
        out_specs=pl.BlockSpec((1, tq, blk), lambda b, g, qi, ki: (b, qi, g)),
        scratch_shapes=[
            pltpu.VMEM((gp, tq, 1), jnp.float32),    # running max
            pltpu.VMEM((gp, tq, 1), jnp.float32),    # running sum
            pltpu.VMEM((gp, tq, Dh), jnp.float32),   # output accumulator
        ],
        compiler_params=pltpu.CompilerParams(
            dimension_semantics=("parallel", "parallel", "parallel", "arbitrary"),
            vmem_limit_bytes=_vmem_limit_bytes(),
        ),
    )(qkv3, qkv3, qkv3)


# ------------------------------ module wrapper ------------------------------

def init_mha_params(key, n_state):
    # Matches nn.init.kaiming_uniform_(a=sqrt(5)) + fan_in bias bound:
    # both reduce to Uniform(-1/sqrt(fan_in), 1/sqrt(fan_in)).
    bound = 1.0 / (n_state ** 0.5)
    ks = jax.random.split(key, 7)
    u = lambda k, shape: jax.random.uniform(k, shape, jnp.float32, -bound, bound)
    return dict(
        wq=u(ks[0], (n_state, n_state)), bq=u(ks[1], (n_state,)),
        wk=u(ks[2], (n_state, n_state)),                      # key has no bias
        wv=u(ks[3], (n_state, n_state)), bv=u(ks[4], (n_state,)),
        wo=u(ks[5], (n_state, n_state)), bo=u(ks[6], (n_state,)),
    )


def pack_params(p, n_head):
    """One-time host-side prep: pre-transpose, fuse and (if needed) lane-pad the
    QKV weights; fold 1/sqrt(Dh) into Q; cast matmul operands to bf16."""
    D = p["wq"].shape[0]
    meta = _head_grouping(D, n_head)
    Dsec, Dh = meta["Dsec"], meta["Dh"]
    pad = Dsec - D
    scale = Dh ** -0.5
    padw = lambda w: jnp.pad(w, ((0, 0), (0, pad))) if pad else w   # (D, D)->(D, Dsec)
    padb = lambda b: jnp.pad(b, (0, pad)) if pad else b

    w_qkv_t = jnp.concatenate(
        [padw(p["wq"].T * scale), padw(p["wk"].T), padw(p["wv"].T)], axis=1
    ).astype(jnp.bfloat16)                                           # (D, 3*Dsec)
    b_qkv = jnp.concatenate(
        [padb(p["bq"] * scale), jnp.zeros((Dsec,), jnp.float32), padb(p["bv"])]
    ).reshape(1, 3 * Dsec).astype(jnp.float32)

    wo_t = p["wo"].T
    if pad:
        wo_t = jnp.pad(wo_t, ((0, pad), (0, 0)))   # zero rows kill the pad lanes
    return dict(
        w_qkv_t=w_qkv_t, b_qkv=b_qkv,
        wo_t=wo_t.astype(jnp.bfloat16), bo=p["bo"].reshape(1, D).astype(jnp.float32),
        meta=meta,
    )


def mha_forward(packed, x, n_head):
    """x: (B, T, n_state) f32. Returns (out, qk) with qk=None, like the reference."""
    B, T, D = x.shape
    meta = packed["meta"]
    tq, tkv, T_pad = _attn_tiles(T)

    xb = x.astype(jnp.bfloat16)                         # bf16 MXU operands
    if T_pad != T:
        xb = jnp.pad(xb, ((0, 0), (0, T_pad - T), (0, 0)))
    x2 = xb.reshape(B * T_pad, D)                       # free reshape

    qkv = pallas_linear(x2, packed["w_qkv_t"], packed["b_qkv"],
                        out_dtype=jnp.bfloat16)         # (B*T_pad, 3*Dsec)
    a = pallas_flash_attention(qkv, B, T_pad, T, meta, tq, tkv)   # (B,T_pad,Dsec)
    out = pallas_linear(a.reshape(B * T_pad, meta["Dsec"]),
                        packed["wo_t"], packed["bo"], out_dtype=jnp.float32)
    out = out.reshape(B, T_pad, D)
    if T_pad != T:
        out = out[:, :T, :]
    return out, None
    # TODO(synk): kv_cache / cross-attention (xa) and causal-mask paths are not
    # exercised by this forward; the same kernels apply with k/v computed from
    # xa and an extra in-kernel mask term.


# ------------------------------ reference check -----------------------------

def mha_reference(params, x, n_head):
    B, T, D = x.shape
    Dh = D // n_head
    q = x @ params["wq"].T + params["bq"]
    k = x @ params["wk"].T
    v = x @ params["wv"].T + params["bv"]
    split = lambda t: t.reshape(B, T, n_head, Dh).transpose(0, 2, 1, 3)
    qh, kh, vh = split(q), split(k), split(v)
    s = jnp.einsum("bhqd,bhkd->bhqk", qh, kh) / (Dh ** 0.5)
    p = jax.nn.softmax(s, axis=-1)
    a = jnp.einsum("bhqk,bhkd->bhqd", p, vh)
    wv = a.transpose(0, 2, 1, 3).reshape(B, T, D)
    return wv @ params["wo"].T + params["bo"]


if __name__ == "__main__":
    key = jax.random.PRNGKey(0)

    configs = [
        # tiny D (not 128-aligned): lane-padded QKV sections, pseudo-head path
        dict(B=2, T=8, n_state=32, n_head=4),
        # Dh=128: zero-copy per-head selection from the fused QKV (G=1)
        dict(B=2, T=8, n_state=256, n_head=2),
        # Dh=64 (Whisper-like): head-batched group G=2 + T padding / kv masking
        dict(B=1, T=20, n_state=256, n_head=4),
    ]

    for cfg in configs:
        B, T, n_state, n_head = cfg["B"], cfg["T"], cfg["n_state"], cfg["n_head"]
        key, k_param, k_x = jax.random.split(key, 3)
        params = init_mha_params(k_param, n_state)
        packed = pack_params(params, n_head)
        x = jax.random.normal(k_x, (B, T, n_state), dtype=jnp.float32)

        out, qk = mha_forward(packed, x, n_head)
        out = jax.block_until_ready(out)

        ref = mha_reference(params, x, n_head)
        assert out.shape == (B, T, n_state)
        assert qk is None
        # bf16 MXU operands (f32 accumulation) -> loose but meaningful tolerance.
        assert jnp.allclose(out, ref, atol=5e-2, rtol=5e-2), (
            f"mismatch vs reference for config {cfg}: "
            f"max abs err={float(jnp.max(jnp.abs(out - ref)))}"
        )

    print("KERNEL_OK")
</pallas_src>

<mosaic_0001>
module attributes {stable_mosaic.version = 11 : i64} {
  func.func @_linear_kernel(%arg0: i32, %arg1: i32, %arg2: i32, %arg3: memref<16x32xbf16, #tpu.memory_space<vmem>>, %arg4: memref<32x128xbf16, #tpu.memory_space<vmem>>, %arg5: memref<1x128xf32, #tpu.memory_space<vmem>>, %arg6: memref<16x128xbf16, #tpu.memory_space<vmem>>, %arg7: memref<16x128xf32, #tpu.memory_space<vmem>>) attributes {dimension_semantics = [#tpu.dimension_semantics<parallel>, #tpu.dimension_semantics<parallel>, #tpu.dimension_semantics<arbitrary>], iteration_bounds = array<i64: 1, 3, 1>, scalar_prefetch = 0 : i64, scratch_operands = 1 : i64, tpu.core_type = #tpu.core_type<tc>, window_params = [{transform_indices = @transform_0, window_bounds = array<i64: 16, 32>}, {transform_indices = @transform_1, window_bounds = array<i64: 32, 128>}, {transform_indices = @transform_2, window_bounds = array<i64: 1, 128>}, {transform_indices = @transform_3, window_bounds = array<i64: 16, 128>}]} {
    %c0_i32 = arith.constant 0 : i32
    %0 = arith.cmpi eq, %arg2, %c0_i32 : i32
    %1 = arith.extui %0 : i1 to i32
    %c0_i32_0 = arith.constant 0 : i32
    %2 = arith.cmpi ne, %1, %c0_i32_0 : i32
    scf.if %2 {
      %cst_10 = arith.constant 0.000000e+00 : f32
      %12 = vector.broadcast %cst_10 : f32 to vector<16x128xf32>
      %c0_11 = arith.constant 0 : index
      %c0_12 = arith.constant 0 : index
      %13 = vector.load %arg7[%c0_11, %c0_12] : memref<16x128xf32, #tpu.memory_space<vmem>>, vector<16x128xf32>
      tpu.vector_store %arg7[%c0_11, %c0_12], %12 {strides = array<i32>} : memref<16x128xf32, #tpu.memory_space<vmem>>, vector<16x128xf32>,
    } else {
    }
    %c0 = arith.constant 0 : index
    %c0_1 = arith.constant 0 : index
    %3 = vector.load %arg7[%c0, %c0_1] : memref<16x128xf32, #tpu.memory_space<vmem>>, vector<16x128xf32>
    %c0_2 = arith.constant 0 : index
    %c0_3 = arith.constant 0 : index
    %4 = vector.load %arg3[%c0_2, %c0_3] : memref<16x32xbf16, #tpu.memory_space<vmem>>, vector<16x32xbf16>
    %c0_4 = arith.constant 0 : index
    %c0_5 = arith.constant 0 : index
    %5 = vector.load %arg4[%c0_4, %c0_5] : memref<32x128xbf16, #tpu.memory_space<vmem>>, vector<32x128xbf16>
    %cst = arith.constant dense<0.000000e+00> : vector<16x128xf32>
    %6 = tpu.matmul %4, %5, %cst {dimension_numbers = #tpu.dot_dimension_numbers<[1], [0], [0], [1], [0, 0, 1, 1], [], []>} : vector<16x32xbf16>, vector<32x128xbf16>, vector<16x128xf32> -> vector<16x128xf32>
    %7 = arith.addf %3, %6 : vector<16x128xf32>
    %c0_6 = arith.constant 0 : index
    %c0_7 = arith.constant 0 : index
    %8 = vector.load %arg7[%c0_6, %c0_7] : memref<16x128xf32, #tpu.memory_space<vmem>>, vector<16x128xf32>
    tpu.vector_store %arg7[%c0_6, %c0_7], %7 {strides = array<i32>} : memref<16x128xf32, #tpu.memory_space<vmem>>, vector<16x128xf32>,
    %c0_i32_8 = arith.constant 0 : i32
    %9 = arith.cmpi eq, %arg2, %c0_i32_8 : i32
    %10 = arith.extui %9 : i1 to i32
    %c0_i32_9 = arith.constant 0 : i32
    %11 = arith.cmpi ne, %10, %c0_i32_9 : i32
    scf.if %11 {
      %c0_10 = arith.constant 0 : index
      %c0_11 = arith.constant 0 : index
      %12 = vector.load %arg7[%c0_10, %c0_11] : memref<16x128xf32, #tpu.memory_space<vmem>>, vector<16x128xf32>
      %c0_12 = arith.constant 0 : index
      %c0_13 = arith.constant 0 : index
      %13 = vector.load %arg5[%c0_12, %c0_13] : memref<1x128xf32, #tpu.memory_space<vmem>>, vector<1x128xf32>
      %14 = vector.broadcast %13 : vector<1x128xf32> to vector<16x128xf32>
      %15 = arith.addf %12, %14 : vector<16x128xf32>
      %16 = arith.truncf %15 : vector<16x128xf32> to vector<16x128xbf16>
      %c0_14 = arith.constant 0 : index
      %c0_15 = arith.constant 0 : index
      %17 = vector.load %arg6[%c0_14, %c0_15] : memref<16x128xbf16, #tpu.memory_space<vmem>>, vector<16x128xbf16>
      tpu.vector_store %arg6[%c0_14, %c0_15], %16 {strides = array<i32>} : memref<16x128xbf16, #tpu.memory_space<vmem>>, vector<16x128xbf16>,
    } else {
    }
    return
  }
  func.func @transform_0(%arg0: i32, %arg1: i32, %arg2: i32) -> (i32, i32) {
    %c0_i32 = arith.constant 0 : i32
    return %arg0, %arg2 : i32, i32
  }
  func.func @transform_1(%arg0: i32, %arg1: i32, %arg2: i32) -> (i32, i32) {
    %c0_i32 = arith.constant 0 : i32
    return %arg2, %arg1 : i32, i32
  }
  func.func @transform_2(%arg0: i32, %arg1: i32, %arg2: i32) -> (i32, i32) {
    %c0_i32 = arith.constant 0 : i32
    %c0_i32_0 = arith.constant 0 : i32
    return %c0_i32, %arg1 : i32, i32
  }
  func.func @transform_3(%arg0: i32, %arg1: i32, %arg2: i32) -> (i32, i32) {
    %c0_i32 = arith.constant 0 : i32
    return %arg0, %arg1 : i32, i32
  }
}

</mosaic_0001>

<bundles_post_ra>
// kernel: tpu_custom_call.1
= control target key start
LH: loop header
LB: loop body
LE: loop exit
PB: predicated region body
PF: predicated region fallthrough
CT: control target
= control target key end

     0   :  { %8 = vsyncpa [#allocation4], 0  ;;  %s987_s0 = inlined_call_operand.hbm [shape: bf16[16,32], index: 0, kind: input, shape index: {}]   ;;  %s988_s1 = inlined_call_operand.hbm [shape: bf16[32,384], index: 1, kind: input, shape index: {}]   ;;  %s989_s2 = inlined_call_operand.hbm [shape: f32[1,384], index: 2, kind: input, shape index: {}]   ;;  %s990_s3 = inlined_call_operand.hbm [shape: bf16[16,384], index: 3, kind: output, shape index: {}]  }
   0x1   :  { %9 = vsyncpa [#allocation7], 0 }
   0x2   :  { %11 = vsyncpa [#allocation7 + $0x1], 0 }
   0x3   :  { %12 = vsyncpa [#allocation5], 0 }
   0x4   :  { %14 = vsyncpa [#allocation5 + $0x1], 0  ;;  %s812_s12 = smov 0   ;;  %s814_s13 = smov 0  }
   0x5   :  { %s816_s14 = smov 0   ;;  %s818_s15 = smov 0  }
   0x6   :  { %s820_s16 = smov 0   ;;  %s822_s17 = smov 0  }
   0x7 LB: > { %s35_s18 = sadd.s32 1, %s779_s16  ;;  %s76_s19 = sadd.s32 1, %s771_s14  ;;  %s783_s17 = sphi %s822_s17, %s20_s17   ;;  %s779_s16 = sphi %s820_s16, %s1001_s16   ;;  %s775_s15 = sphi %s818_s15, %s1000_s15   ;;  %s771_s14 = sphi %s816_s14, %s999_s14   ;;  %s767_s13 = sphi %s814_s13, %s998_s13   ;;  %s763_s12 = sphi %s812_s12, %s997_s12  }
   0x8   : > { %p37_p0 = scmp.ge.s32.totalorder %s35_s18, 3  ;;  %p83_p1 = scmp.ne.s32.totalorder %s771_s14, %s767_s13 }
   0x9   : > { %p84_p2 = scmp.eq.s32.totalorder %s783_s17, 0  ;;  %p548_p5 = scmp.lt.s32.totalorder %s783_s17, 3 }
   0xa   : > { %s1003_s18 = smov (%p37_p0, %s35_s18), 0  ;;  %s185_s22 = sand.u32 1, %s783_s17  }
   0xb   : > { %p852_p3 = por %p84_p2, %p83_p1  ;;  %s72_s21 = ssub.s32 %s779_s16, %s1003_s18 }
   0xc   : > { %p74_p4 = scmp.eq.s32.totalorder %s72_s21, 0  ;;  %s187_s23 = sand.u32 1, %s771_s14  }
   0xd   : > { %s491_s25 = sshll.u32 %s187_s23, 4  ;;  %s492_s26 = sshll.u32 %s779_s16, 2 }
   0xe   : > { %s862_s24 = scalar_select %p74_p4, %s771_s14, %s76_s19  }
   0xf   : > { %s196_s29 = scalar_lea.hbm %s988_s1, %s492_s26  ;;  %s189_s30 = scalar_lea.vmem [#allocation6], %s491_s25 }
  0x10   : > { %s199_s4 = sshll.u32 %s189_s30, 4  ;;  %s197_s5 = sshll.u32 %s196_s29, 4  ;;  %s200_s4 = int_to_ptr.vmem [resolvable:$true] %s199_s4  ;;  %s198_s5 = int_to_ptr.hbm [resolvable:$true] %s197_s5 }
  0x11   : > { %p872_p6 = pnand %p548_p5, %p852_p3  ;;  %s876_s7 = scalar_lea.sflag [#allocation7], %s185_s22 }
  0x12   : > { %s785_s8 = smov 192   ;;  %s786_s9 = smov 64  }
  0x13   : > { %s787_s10 = smov 4   ;;  %s884_s11 = sadd.s32 4294967295, %s783_s17  }
  0x14   : > { %539 = dma.hbm_to_vmem [thread:$0]  (!%p872_p6), %s198_s5, 256, %s200_s4, %s876_s7, %s785_s8, %s786_s9, %s787_s10  }
  0x15   : > { %s487_s19 = sadd.s32 4294967294, %s783_s17   ;;  %p89_p7 = scmp.ne.s32.totalorder %s767_s13, %s763_s12 }
  0x16   : > { %p90_p8 = scmp.eq.s32.totalorder %s884_s11, 0  ;;  %p141_p9 = scmp.eq.s32.totalorder %s884_s11, 2 }
  0x17   : > { %p147_p10 = scmp.eq.s32.totalorder %s487_s19, 2  ;;  %p488_p12 = scmp.ge.s32.totalorder %s783_s17, 1 }
  0x18   : > { %p893_p11 = por %p90_p8, %p89_p7  ;;  %p901_p13 = por %p141_p9, %p83_p1 }
  0x19   : > { %p905_p0 = por %p147_p10, %p89_p7  ;;  %p154_p2 = scmp.lt.s32.totalorder %s783_s17, 4 }
  0x1a   : > { %s169_s27 = sshll.u32 %s987_s0, 4  ;;  %s788_s29 = smov [#allocation3]   ;;  %s170_s27 = int_to_ptr.hbm [resolvable:$true] %s169_s27 }
  0x1b   : > { %p913_p3 = pnand %p488_p12, %p154_p2  ;;  %s171_s30 = sshll.u32 %s788_s29, 4  ;;  %s172_s30 = int_to_ptr.vmem [resolvable:$true] %s171_s30 }
  0x1c   : > { %s215_s8 = scalar_lea.hbm %s989_s2, %s779_s16  ;;  %s212_s19 = scalar_lea.vmem [#allocation8], %s187_s23 }
  0x1d   : > { %p532_p1 = pneg %p913_p3  ;;  %s219_s25 = sshll.u32 %s212_s19, 4  ;;  %s220_s25 = int_to_ptr.vmem [resolvable:$true] %s219_s25 }
  0x1e   : > { %s217_s26 = sshll.u32 %s215_s8, 4  ;;  %228 = sbr.rel (%p913_p3) target bundleno = 191 (0xbf), region = 32  ;;  %s218_s26 = int_to_ptr.hbm [resolvable:$true] %s217_s26 }
  0x1f   : > { %p533_p4 = pnand %p532_p1, %p90_p8 }
  0x20   : > { %542 = dma.hbm_to_vmem [thread:$0]  (!%p872_p6), %s218_s26, 16, %s220_s25, %s876_s7  }
  0x21   : > { %535 = dma.hbm_to_vmem [thread:$0]  (!%p533_p4), %s170_s27, 128, %s172_s30, [#allocation4], %s786_s9, %s786_s9, %s787_s10  }
  0x23   : > { %750 = dma.done.wait (%p90_p8), [#allocation4], 128  }
  0x24   : > { %752 = vsyncadd (%p90_p8), [#allocation4], 4294967168  ;;  %s235_s23 = sand.u32 1, %s884_s11   ;;  %s941_s29 = sand.u32 1, %s767_s13  }
  0x25   : > { %s495_s4 = sshll.u32 %s941_s29, 4  ;;  %s236_s9 = scalar_lea.sflag [#allocation7], %s235_s23 }
  0x26   : > { %s239_s6 = scalar_lea.vmem [#allocation6], %s495_s4 }
  0x27   : > { %754 = dma.done.wait (%p893_p11), %s236_s9, 272  }
  0x28   : > { %756 = vsyncadd (%p893_p11), %s236_s9, 4294967024  ;;  %v516_v0 = vld [vmem:[%s239_s6 + $0x8] sm:$0xff]  ;;  %s248_s7 = scalar_lea.vmem [#allocation8], %s941_s29  ;;  %v515_v1 = vld [vmem:[%s239_s6] sm:$0xff]  ;;  %vm311_vm0 = vcmask 261120   ;;  %s496_s10 = sshll.u32 %s941_s29, 3 }
  0x29   : > { %321 = vmatpush.bf16.msra.mxu0 %v516_v0  ;;  %v514_v2 = vld [vmem:[#allocation3] sm:$0xff]  ;;  %s511_s11 = sshll.u32 %s775_s15, 2  ;;  %s275_s30 = scalar_lea.vmem [#allocation9], %s496_s10 }
  0x2a   : > { %s362_s20 = scalar_lea.hbm %s990_s3, %s511_s11  ;;  %v606_v4 = vld [vmem:[%s248_s7] ss:$0 sm:$0xff]  ;;  %s363_s5 = sshll.u32 %s275_s30, 4  ;;  %s364_s5 = int_to_ptr.vmem [resolvable:$true] %s363_s5 }
  0x2b   : > { %s365_s8 = sshll.u32 %s362_s20, 4  ;;  %s349_s19 = scalar_lea.sflag [#allocation5], %s941_s29  ;;  %s366_s8 = int_to_ptr.hbm [resolvable:$true] %s365_s8 }
  0x2c   : > { %s711_s25 = sshra.s32 %s366_s8, 4  ;;  %s717_s4 = scalar_lea.hbm %s990_s3, 24  ;;  %s712_s25 = int_to_ptr.hbm [resolvable:$true] %s711_s25 }
  0x2d   : > { %322 = vmatpush.bf16.msra.mxu0 %v515_v1  ;;  %s713_s15 = scalar_lea.hbm %s712_s25, 8  ;;  %p718_p8 = scmp.lt.s32.totalorder %s712_s25, %s990_s3 }
  0x2e   : > { %p714_p5 = scmp.ne.s32.totalorder %s712_s25, %s713_s15  ;;  %p719_p9 = scmp.lt.s32.totalorder %s717_s4, %s713_s15 }
  0x30   : > { %509 = vmatmul.msk.bf16.vlgmr.msra.gmra.mxu0 %vm311_vm0, %v514_v2  ;;  %p715_p6 = pnand %p714_p5, %p901_p13  ;;  %p720_p10 = por %p719_p9, %p718_p8 }
  0x32   : > { %p716_p7 = pneg %p715_p6 }
  0x34   : > { %p721_p11 = pnand %p720_p10, %p716_p7 }
  0xad   : > { %v324_v3 = vpop.f32.mrf.mxu0 }
  0xae   : > { %v342_v6 = vadd.f32 %v606_v4, %v324_v3 }
  0xb5   : > { %v326_v5 = vpop.f32.mrf.mxu0 }
  0xb6   : > { %v343_v7 = vadd.f32 %v606_v4, %v326_v5 }
  0xb8   : > { %v520_v8 = vpack.c.bf16 %v343_v7, %v342_v6 }
  0xba   : > { %521 = vst [vmem:[%s275_s30] sm:$0xff] %v520_v8  }
  0xbb   : > { %724 = shalt.err (!%p721_p11)
}
  0xbc   : > { %s789_s29 = smov 64   ;;  %s790_s7 = smov 192  }
  0xbd   : > { %s791_s10 = smov 4  }
  0xbe   : > { %530 = dma.vmem_to_hbm [thread:$0]  (%p901_p13), %s364_s5, 128, %s366_s8, %s349_s19, %s789_s29, %s790_s7, %s791_s10  }
  0xbf PF: > { %p550_p12 = scmp.ge.s32.totalorder %s783_s17, 2  ;;  %s380_s11 = sand.u32 1, %s763_s12  }
  0xc0   : > { %s381_s27 = scalar_lea.sflag [#allocation5], %s380_s11 }
  0xc1   : > { %p544_p2 = pnand %p550_p12, %p905_p0 }
  0xc3   : > { %p545_p3 = pneg %p544_p2 }
  0xc5   : > { %758 = dma.done.wait (%p545_p3), %s381_s27, 128  }
  0xc6   : > { %760 = vsyncadd (%p545_p3), %s381_s27, 4294967168  ;;  %s20_s17 = sadd.s32 1, %s783_s17   ;;  %s997_s12 = smov %s767_s13 }
  0xc7   : > { %p17_p1 = scmp.ge.s32.totalorder %s20_s17, 5   ;;  %s998_s13 = smov %s771_s14 }
  0xc8   : > { %s999_s14 = smov %s862_s24  ;;  %s1000_s15 = smov %s779_s16 }
  0xc9   : > { %s1001_s16 = smov %s1003_s18  ;;  %19 = sbr.rel (!%p17_p1) target bundleno = 7 (0x7), region = 102 }
  0xce   :  { %387 = vsyncpa [#allocation4], 1 }
  0xcf   :  { %389 = vsyncpa [#allocation4 + $0x1], 1 }
  0xd0   :  { %390 = vsyncpa [#allocation7], 1 }
  0xd1   :  { %392 = vsyncpa [#allocation7 + $0x1], 1 }
  0xd2   :  { %393 = vsyncpa [#allocation5], 1 }
  0xd3   :  { %395 = vsyncpa [#allocation5 + $0x1], 1 }

</bundles_post_ra>
